<compile_context>
chip_gen: v7x
topology: tpu7x:2x2x1
jax: 0.10.0
libtpu: 0.0.40
codegen_flags: <defaults>
</compile_context>

<pallas_src>
import functools

import jax
import jax.numpy as jnp
from jax.experimental import pallas as pl
from jax.experimental.pallas import tpu as pltpu


def _atten_fused_kernel(x_ref, y_ref, w1t_ref, w2_ref, out_ref, sc_ref, *, sx, tsx):
    """Grid = (N, 2, T).

    phase p==0: running per-channel max over x spatial tiles into sc_ref (1, C, 1);
                on the last tile: sc_ref <- 1 + sigmoid(fc2(relu(fc1(max)))).
    phase p==1: out tile = y tile * sc_ref   (residual add folded into the scale).
    """
    p = pl.program_id(1)
    s = pl.program_id(2)

    @pl.when(p == 0)
    def _reduce_phase():
        @pl.when(s == 0)
        def _init():
            sc_ref[...] = jnp.full(sc_ref.shape, -jnp.inf, sc_ref.dtype)

        xv = x_ref[...]                                               # (1, C, tsx), native dtype
        if sx % tsx != 0:
            # cdiv tail: mask lanes past the true spatial extent before the max.
            lane = jax.lax.broadcasted_iota(jnp.int32, xv.shape, 2)
            xv = jnp.where(s * tsx + lane < sx, xv, jnp.full_like(xv, -jnp.inf))
        # max is exact in the input dtype; only cast the (1, C, 1) result to f32.
        tile_max = jnp.max(xv, axis=-1, keepdims=True).astype(jnp.float32)
        sc_ref[...] = jnp.maximum(sc_ref[...], tile_max)

        @pl.when(s == pl.num_programs(2) - 1)
        def _finalize():
            c = sc_ref.shape[1]
            m = sc_ref[...].reshape(c, 1)                             # (C, 1), channels on sublanes
            # fc1 + ReLU: (C,1)*(C,C//16) -> sublane-reduce -> (1, C//16)
            hidden = jnp.maximum(
                jnp.sum(m * w1t_ref[...], axis=0, keepdims=True), 0.0)
            # fc2: (1,C//16)*(C,C//16) -> lane-reduce -> (C, 1)
            a = jnp.sum(hidden * w2_ref[...], axis=-1, keepdims=True)
            scale = 1.0 + 1.0 / (1.0 + jnp.exp(-a))                   # fold the residual '+ y'
            sc_ref[...] = scale.reshape(sc_ref.shape)                 # (1, C, 1), no relayout

    @pl.when(p == 1)
    def _apply_phase():
        yv = y_ref[...]                                               # (1, C, tsy), native dtype
        out_ref[...] = (yv * sc_ref[...].astype(yv.dtype)).astype(out_ref.dtype)


def _vmem_plan():
    """Scoped-VMEM limit and per-block byte budget, generation aware (v7x: 64 MiB VMEM)."""
    try:
        cap = int(pltpu.get_tpu_info().vmem_capacity_bytes)
    except Exception:
        cap = 64 * 1024 * 1024
    vmem_limit = min(cap * 3 // 4, 96 * 1024 * 1024)          # 96 MiB v5e/v6e, 48 MiB v7x
    # x-in, y-in, out blocks are each double-buffered -> ~6 live blocks + tiny scratch/weights.
    block_budget = max(64 * 1024, min(8 * 1024 * 1024, (vmem_limit - (2 << 20)) // 6))
    return vmem_limit, block_budget


def _pick_spatial_tile(s, c, elem_bytes, block_budget):
    """Lane-dense spatial tile: full extent if it fits, else a multiple of 128 lanes.

    Prefers an exact divisor of `s` (no masked tail); otherwise the grid uses pl.cdiv
    and the kernel masks the reduction tail / relies on masked partial output writes.
    """
    if s <= 128:
        return s
    cap = max(128, block_budget // max(1, c * elem_bytes))
    if cap >= s:
        return s
    cap = (cap // 128) * 128
    best = 0
    for ts in range(cap, 127, -128):
        if s % ts == 0:
            best = ts
            break
    if best >= max(1024, cap // 2):
        return best
    return cap


def atten_block_3d(x, y, w_fc1, w_fc2, *, spatial_tile_x=None, spatial_tile_y=None):
    """out = y + y * ChannelAttention_3D(x).  Output dtype follows y.dtype."""
    n, c, dx, hx, wx = x.shape
    ny, cy, dy, hy, wy = y.shape
    assert (n, c) == (ny, cy), "x and y must share batch / channel dims"
    c2 = w_fc1.shape[0]
    assert c2 >= 1 and tuple(w_fc1.shape[:2]) == (c2, c) and tuple(w_fc2.shape[:2]) == (c, c2)

    sx = dx * hx * wx
    sy = dy * hy * wy
    x3 = x.reshape(n, c, sx)                       # free reshape of contiguous NCDHW
    y3 = y.reshape(n, c, sy)

    # 1x1x1 conv weights, laid out with channels on sublanes so the in-kernel MLP
    # never needs a lane<->sublane relayout.
    w1t = w_fc1.reshape(c2, c).T.astype(jnp.float32)    # (C, C//16)
    w2 = w_fc2.reshape(c, c2).astype(jnp.float32)       # (C, C//16)

    vmem_limit, block_budget = _vmem_plan()
    itemsize = max(x3.dtype.itemsize, y3.dtype.itemsize)
    tsx = spatial_tile_x or _pick_spatial_tile(sx, c, itemsize, block_budget)
    tsy = spatial_tile_y or _pick_spatial_tile(sy, c, itemsize, block_budget)
    assert tsx == sx or tsx % 128 == 0, "x spatial tile must be a multiple of 128 lanes"
    assert tsy == sy or tsy % 128 == 0, "y spatial tile must be a multiple of 128 lanes"

    tx = pl.cdiv(sx, tsx)
    ty = pl.cdiv(sy, tsy)
    t = max(tx, ty)

    def x_index(i, p, s):
        # phase 0: walk x tiles (clamped if y needs more steps); phase 1: park on the
        # last x tile so no extra DMA is issued across the phase boundary.
        return (i, 0, (1 - p) * jnp.minimum(s, tx - 1) + p * (tx - 1))

    def y_index(i, p, s):
        # phase 0: hold tile 0 (acts as a prefetch of phase 1's first tile);
        # phase 1: walk y tiles.
        return (i, 0, p * jnp.minimum(s, ty - 1))

    kernel = functools.partial(_atten_fused_kernel, sx=sx, tsx=tsx)

    # NOTE: only the batch axis is megacore-shardable; a v7x-only split of the N==1
    # reduction across the two TensorCores is intentionally left out for simplicity.
    out3 = pl.pallas_call(
        kernel,
        out_shape=jax.ShapeDtypeStruct((n, c, sy), y.dtype),
        grid_spec=pltpu.PrefetchScalarGridSpec(
            num_scalar_prefetch=0,
            grid=(n, 2, t),
            in_specs=[
                pl.BlockSpec((1, c, tsx), x_index),
                pl.BlockSpec((1, c, tsy), y_index),
                pl.BlockSpec((c, c2), lambda i, p, s: (0, 0)),   # VMEM-resident weights
                pl.BlockSpec((c, c2), lambda i, p, s: (0, 0)),
            ],
            out_specs=pl.BlockSpec((1, c, tsy), y_index),
            scratch_shapes=[pltpu.VMEM((1, c, 1), jnp.float32)],
        ),
        compiler_params=pltpu.CompilerParams(
            dimension_semantics=("parallel", "arbitrary", "arbitrary"),
            vmem_limit_bytes=int(vmem_limit),
        ),
    )(x3, y3, w1t, w2)

    return out3.reshape(n, c, dy, hy, wy)


def reference(x, y, w_fc1, w_fc2):
    """Pure-JAX mirror of AttenBlock_3D.forward."""
    c = x.shape[1]
    c2 = w_fc1.shape[0]
    m = jnp.max(x, axis=(2, 3, 4))                                       # AdaptiveMaxPool3d(1)
    hdn = jnp.maximum(jnp.einsum("nc,jc->nj", m, w_fc1.reshape(c2, c)), 0.0)
    att = jax.nn.sigmoid(jnp.einsum("nj,cj->nc", hdn, w_fc2.reshape(c, c2)))
    return y + y * att[:, :, None, None, None]


if __name__ == "__main__":
    # channel=32 is the module default (so C//16 = 2); small 3D spatial dims.
    N, C, D, H, W = 2, 32, 8, 16, 16

    key = jax.random.PRNGKey(0)
    kx, ky, k1, k2 = jax.random.split(key, 4)
    x = jax.random.normal(kx, (N, C, D, H, W), dtype=jnp.float32)
    y = jax.random.normal(ky, (N, C, D, H, W), dtype=jnp.float32)
    w_fc1 = 0.3 * jax.random.normal(k1, (C // 16, C, 1, 1, 1), dtype=jnp.float32)  # Conv3d(C, C//16, 1)
    w_fc2 = 0.3 * jax.random.normal(k2, (C, C // 16, 1, 1, 1), dtype=jnp.float32)  # Conv3d(C//16, C, 1)

    ref = reference(x, y, w_fc1, w_fc2)

    # Default path: single spatial block per batch row at these small shapes.
    out = jax.block_until_ready(atten_block_3d(x, y, w_fc1, w_fc2))
    assert out.shape == ref.shape == (N, C, D, H, W)
    assert jnp.allclose(out, ref, atol=1e-5, rtol=1e-5), "mismatch (default tiling)"

    # Multi-tile reduce/apply with mismatched tile counts (exercises index clamping).
    out_tiled = jax.block_until_ready(
        atten_block_3d(x, y, w_fc1, w_fc2, spatial_tile_x=256, spatial_tile_y=512))
    assert jnp.allclose(out_tiled, ref, atol=1e-5, rtol=1e-5), "mismatch (forced tiling)"

    # Non-dividing x tile (exercises the masked cdiv tail in the max reduction).
    out_tail = jax.block_until_ready(
        atten_block_3d(x, y, w_fc1, w_fc2, spatial_tile_x=384, spatial_tile_y=512))
    assert jnp.allclose(out_tail, ref, atol=1e-5, rtol=1e-5), "mismatch (masked tail)"

    print("KERNEL_OK")
</pallas_src>

<mosaic_0001>
module attributes {stable_mosaic.version = 11 : i64} {
  func.func @_atten_fused_kernel(%arg0: i32, %arg1: i32, %arg2: i32, %arg3: memref<1x32x2048xf32, #tpu.memory_space<vmem>>, %arg4: memref<1x32x2048xf32, #tpu.memory_space<vmem>>, %arg5: memref<32x2xf32, #tpu.memory_space<vmem>>, %arg6: memref<32x2xf32, #tpu.memory_space<vmem>>, %arg7: memref<1x32x2048xf32, #tpu.memory_space<vmem>>, %arg8: memref<1x32x1xf32, #tpu.memory_space<vmem>>) attributes {dimension_semantics = [#tpu.dimension_semantics<parallel>, #tpu.dimension_semantics<arbitrary>, #tpu.dimension_semantics<arbitrary>], iteration_bounds = array<i64: 2, 2, 1>, scalar_prefetch = 0 : i64, scratch_operands = 1 : i64, tpu.core_type = #tpu.core_type<tc>, window_params = [{transform_indices = @transform_0, window_bounds = array<i64: 1, 32, 2048>}, {transform_indices = @transform_1, window_bounds = array<i64: 1, 32, 2048>}, {pipeline_mode = #tpu.pipeline_mode<synchronous>, transform_indices = @transform_2, window_bounds = array<i64: 32, 2>}, {pipeline_mode = #tpu.pipeline_mode<synchronous>, transform_indices = @transform_3, window_bounds = array<i64: 32, 2>}, {transform_indices = @transform_4, window_bounds = array<i64: 1, 32, 2048>}]} {
    %c0_i32 = arith.constant 0 : i32
    %0 = arith.cmpi eq, %arg1, %c0_i32 : i32
    %1 = arith.extui %0 : i1 to i32
    %c0_i32_0 = arith.constant 0 : i32
    %2 = arith.cmpi ne, %1, %c0_i32_0 : i32
    scf.if %2 {
      %c0_i32_2 = arith.constant 0 : i32
      %6 = arith.cmpi eq, %arg2, %c0_i32_2 : i32
      %7 = arith.extui %6 : i1 to i32
      %c0_i32_3 = arith.constant 0 : i32
      %8 = arith.cmpi ne, %7, %c0_i32_3 : i32
      scf.if %8 {
        %cst_14 = arith.constant 0xFF800000 : f32
        %18 = vector.broadcast %cst_14 : f32 to vector<1x32x1xf32>
        %c0_15 = arith.constant 0 : index
        %c0_16 = arith.constant 0 : index
        %c0_17 = arith.constant 0 : index
        %19 = vector.load %arg8[%c0_15, %c0_16, %c0_17] : memref<1x32x1xf32, #tpu.memory_space<vmem>>, vector<1x32x1xf32>
        tpu.vector_store %arg8[%c0_15, %c0_16, %c0_17], %18 {strides = array<i32>} : memref<1x32x1xf32, #tpu.memory_space<vmem>>, vector<1x32x1xf32>,
      } else {
      }
      %c0 = arith.constant 0 : index
      %c0_4 = arith.constant 0 : index
      %c0_5 = arith.constant 0 : index
      %9 = vector.load %arg3[%c0, %c0_4, %c0_5] : memref<1x32x2048xf32, #tpu.memory_space<vmem>>, vector<1x32x2048xf32>
      %cst = arith.constant dense<0xFF800000> : vector<1x32xf32>
      %10 = vector.multi_reduction <maximumf>, %9, %cst [2] : vector<1x32x2048xf32> to vector<1x32xf32>
      %11 = vector.shape_cast %10 : vector<1x32xf32> to vector<1x32x1xf32>
      %c0_6 = arith.constant 0 : index
      %c0_7 = arith.constant 0 : index
      %c0_8 = arith.constant 0 : index
      %12 = vector.load %arg8[%c0_6, %c0_7, %c0_8] : memref<1x32x1xf32, #tpu.memory_space<vmem>>, vector<1x32x1xf32>
      %13 = arith.maximumf %12, %11 : vector<1x32x1xf32>
      %c0_9 = arith.constant 0 : index
      %c0_10 = arith.constant 0 : index
      %c0_11 = arith.constant 0 : index
      %14 = vector.load %arg8[%c0_9, %c0_10, %c0_11] : memref<1x32x1xf32, #tpu.memory_space<vmem>>, vector<1x32x1xf32>
      tpu.vector_store %arg8[%c0_9, %c0_10, %c0_11], %13 {strides = array<i32>} : memref<1x32x1xf32, #tpu.memory_space<vmem>>, vector<1x32x1xf32>,
      %c0_i32_12 = arith.constant 0 : i32
      %15 = arith.cmpi eq, %arg2, %c0_i32_12 : i32
      %16 = arith.extui %15 : i1 to i32
      %c0_i32_13 = arith.constant 0 : i32
      %17 = arith.cmpi ne, %16, %c0_i32_13 : i32
      scf.if %17 {
        %c0_14 = arith.constant 0 : index
        %c0_15 = arith.constant 0 : index
        %c0_16 = arith.constant 0 : index
        %18 = vector.load %arg8[%c0_14, %c0_15, %c0_16] : memref<1x32x1xf32, #tpu.memory_space<vmem>>, vector<1x32x1xf32>
        %19 = vector.shape_cast %18 : vector<1x32x1xf32> to vector<32x1xf32>
        %c0_17 = arith.constant 0 : index
        %c0_18 = arith.constant 0 : index
        %20 = vector.load %arg5[%c0_17, %c0_18] : memref<32x2xf32, #tpu.memory_space<vmem>>, vector<32x2xf32>
        %21 = vector.broadcast %19 : vector<32x1xf32> to vector<32x2xf32>
        %22 = arith.mulf %21, %20 : vector<32x2xf32>
        %cst_19 = arith.constant dense<0.000000e+00> : vector<2xf32>
        %23 = vector.multi_reduction <add>, %22, %cst_19 [0] : vector<32x2xf32> to vector<2xf32>
        %24 = vector.shape_cast %23 : vector<2xf32> to vector<1x2xf32>
        %cst_20 = arith.constant 0.000000e+00 : f32
        %25 = vector.broadcast %cst_20 : f32 to vector<1x2xf32>
        %26 = arith.maximumf %24, %25 : vector<1x2xf32>
        %c0_21 = arith.constant 0 : index
        %c0_22 = arith.constant 0 : index
        %27 = vector.load %arg6[%c0_21, %c0_22] : memref<32x2xf32, #tpu.memory_space<vmem>>, vector<32x2xf32>
        %28 = vector.broadcast %26 : vector<1x2xf32> to vector<32x2xf32>
        %29 = arith.mulf %28, %27 : vector<32x2xf32>
        %cst_23 = arith.constant dense<0.000000e+00> : vector<32xf32>
        %30 = vector.multi_reduction <add>, %29, %cst_23 [1] : vector<32x2xf32> to vector<32xf32>
        %31 = vector.shape_cast %30 : vector<32xf32> to vector<32x1xf32>
        %cst_24 = arith.constant 0.000000e+00 : f32
        %32 = vector.broadcast %cst_24 : f32 to vector<32x1xf32>
        %33 = arith.subf %32, %31 : vector<32x1xf32>
        %34 = math.exp %33 : vector<32x1xf32>
        %cst_25 = arith.constant 1.000000e+00 : f32
        %35 = vector.broadcast %cst_25 : f32 to vector<32x1xf32>
        %36 = arith.addf %35, %34 : vector<32x1xf32>
        %cst_26 = arith.constant 1.000000e+00 : f32
        %37 = vector.broadcast %cst_26 : f32 to vector<32x1xf32>
        %38 = arith.divf %37, %36 : vector<32x1xf32>
        %cst_27 = arith.constant 1.000000e+00 : f32
        %39 = vector.broadcast %cst_27 : f32 to vector<32x1xf32>
        %40 = arith.addf %39, %38 : vector<32x1xf32>
        %41 = vector.shape_cast %40 : vector<32x1xf32> to vector<1x32x1xf32>
        %c0_28 = arith.constant 0 : index
        %c0_29 = arith.constant 0 : index
        %c0_30 = arith.constant 0 : index
        %42 = vector.load %arg8[%c0_28, %c0_29, %c0_30] : memref<1x32x1xf32, #tpu.memory_space<vmem>>, vector<1x32x1xf32>
        tpu.vector_store %arg8[%c0_28, %c0_29, %c0_30], %41 {strides = array<i32>} : memref<1x32x1xf32, #tpu.memory_space<vmem>>, vector<1x32x1xf32>,
      } else {
      }
    } else {
    }
    %c1_i32 = arith.constant 1 : i32
    %3 = arith.cmpi eq, %arg1, %c1_i32 : i32
    %4 = arith.extui %3 : i1 to i32
    %c0_i32_1 = arith.constant 0 : i32
    %5 = arith.cmpi ne, %4, %c0_i32_1 : i32
    scf.if %5 {
      %c0 = arith.constant 0 : index
      %c0_2 = arith.constant 0 : index
      %c0_3 = arith.constant 0 : index
      %6 = vector.load %arg4[%c0, %c0_2, %c0_3] : memref<1x32x2048xf32, #tpu.memory_space<vmem>>, vector<1x32x2048xf32>
      %c0_4 = arith.constant 0 : index
      %c0_5 = arith.constant 0 : index
      %c0_6 = arith.constant 0 : index
      %7 = vector.load %arg8[%c0_4, %c0_5, %c0_6] : memref<1x32x1xf32, #tpu.memory_space<vmem>>, vector<1x32x1xf32>
      %8 = vector.broadcast %7 : vector<1x32x1xf32> to vector<1x32x2048xf32>
      %9 = arith.mulf %6, %8 : vector<1x32x2048xf32>
      %c0_7 = arith.constant 0 : index
      %c0_8 = arith.constant 0 : index
      %c0_9 = arith.constant 0 : index
      %10 = vector.load %arg7[%c0_7, %c0_8, %c0_9] : memref<1x32x2048xf32, #tpu.memory_space<vmem>>, vector<1x32x2048xf32>
      tpu.vector_store %arg7[%c0_7, %c0_8, %c0_9], %9 {strides = array<i32>} : memref<1x32x2048xf32, #tpu.memory_space<vmem>>, vector<1x32x2048xf32>,
    } else {
    }
    return
  }
  func.func @transform_0(%arg0: i32, %arg1: i32, %arg2: i32) -> (i32, i32, i32) {
    %c1_i32 = arith.constant 1 : i32
    %0 = arith.subi %c1_i32, %arg1 : i32
    %c0_i32 = arith.constant 0 : i32
    %1 = arith.minsi %arg2, %c0_i32 : i32
    %2 = arith.muli %0, %1 : i32
    %c0_i32_0 = arith.constant 0 : i32
    %3 = arith.muli %arg1, %c0_i32_0 : i32
    %4 = arith.addi %2, %3 : i32
    %c0_i32_1 = arith.constant 0 : i32
    %c0_i32_2 = arith.constant 0 : i32
    return %arg0, %c0_i32_1, %4 : i32, i32, i32
  }
  func.func @transform_1(%arg0: i32, %arg1: i32, %arg2: i32) -> (i32, i32, i32) {
    %c0_i32 = arith.constant 0 : i32
    %0 = arith.minsi %arg2, %c0_i32 : i32
    %1 = arith.muli %arg1, %0 : i32
    %c0_i32_0 = arith.constant 0 : i32
    %c0_i32_1 = arith.constant 0 : i32
    return %arg0, %c0_i32_0, %1 : i32, i32, i32
  }
  func.func @transform_2(%arg0: i32, %arg1: i32, %arg2: i32) -> (i32, i32) {
    %c0_i32 = arith.constant 0 : i32
    %c0_i32_0 = arith.constant 0 : i32
    %c0_i32_1 = arith.constant 0 : i32
    return %c0_i32, %c0_i32_0 : i32, i32
  }
  func.func @transform_3(%arg0: i32, %arg1: i32, %arg2: i32) -> (i32, i32) {
    %c0_i32 = arith.constant 0 : i32
    %c0_i32_0 = arith.constant 0 : i32
    %c0_i32_1 = arith.constant 0 : i32
    return %c0_i32, %c0_i32_0 : i32, i32
  }
  func.func @transform_4(%arg0: i32, %arg1: i32, %arg2: i32) -> (i32, i32, i32) {
    %c0_i32 = arith.constant 0 : i32
    %0 = arith.minsi %arg2, %c0_i32 : i32
    %1 = arith.muli %arg1, %0 : i32
    %c0_i32_0 = arith.constant 0 : i32
    %c0_i32_1 = arith.constant 0 : i32
    return %arg0, %c0_i32_0, %1 : i32, i32, i32
  }
}

</mosaic_0001>

<bundles_post_ra>
// kernel: tpu_custom_call.1
= control target key start
LH: loop header
LB: loop body
LE: loop exit
PB: predicated region body
PF: predicated region fallthrough
CT: control target
= control target key end

     0   :  { %s1811_s0 = inlined_call_operand.hbm [shape: f32[2,32,2048], index: 0, kind: input, shape index: {}]   ;;  %s1812_s1 = inlined_call_operand.hbm [shape: f32[2,32,2048], index: 1, kind: input, shape index: {}]   ;;  %s1813_s2 = inlined_call_operand.vmem [shape: f32[32,2], index: 2, kind: input, shape index: {}]   ;;  %s1814_s3 = inlined_call_operand.vmem [shape: f32[32,2], index: 3, kind: input, shape index: {}]   ;;  %s1815_s4 = inlined_call_operand.hbm [shape: f32[2,32,2048], index: 4, kind: output, shape index: {}]  }
   0x1   :  { %1822 = sst [smem:[#allocation14_spill]] %s1811_s0 }
   0x2   :  { %9 = vsyncpa [#allocation4], 0 }
   0x3   :  { %11 = vsyncpa [#allocation4 + $0x1], 0 }
   0x4   :  { %12 = vsyncpa [#allocation7], 0 }
   0x5   :  { %14 = vsyncpa [#allocation7 + $0x1], 0 }
   0x6   :  { %15 = vsyncpa [#allocation5], 0 }
   0x7   :  { %17 = vsyncpa [#allocation5 + $0x1], 0  ;;  %s1276_s15 = smov 0   ;;  %s1278_s16 = smov 0  }
   0x8   :  { %s1280_s17 = smov 0   ;;  %s1282_s18 = smov 0  }
   0x9   :  { %s1284_s19 = smov 0   ;;  %s1286_s20 = smov 0  }
   0xa   :  { %s1288_s21 = smov 0   ;;  %s1290_s22 = smov 0  }
   0xb LB: > { %s943_s23 = sadd.s32 4294967295, %s1239_s22   ;;  %s944_s24 = sadd.s32 4294967294, %s1239_s22   ;;  %s1239_s22 = sphi %s1290_s22, %s23_s22   ;;  %s1235_s21 = sphi %s1288_s21, %s1847_s21   ;;  %s1231_s20 = sphi %s1286_s20, %s1846_s20   ;;  %s1227_s19 = sphi %s1284_s19, %s1845_s19   ;;  %s1223_s18 = sphi %s1282_s18, %s1844_s18   ;;  %s1219_s17 = sphi %s1280_s17, %s1843_s17   ;;  %s1215_s16 = sphi %s1278_s16, %s1842_s16   ;;  %s1211_s15 = sphi %s1276_s15, %s1841_s15  }
   0xc   : > { %s38_s25 = sadd.s32 1, %s1231_s20  ;;  %s42_s26 = sadd.s32 1, %s1235_s21 }
   0xd   : > { %p40_p0 = scmp.ge.s32.totalorder %s38_s25, 2  ;;  %s59_s27 = sadd.s32 1, %s1219_s17 }
   0xe   : > { %p66_p1 = scmp.ne.s32.totalorder %s1219_s17, %s1215_s16  ;;  %p67_p2 = scmp.eq.s32.totalorder %s1239_s22, 0 }
   0xf   : > { %s1849_s25 = smov (%p40_p0, %s38_s25), 0  ;;  %s1851_s26 = smov (!%p40_p0, %s42_s26), %s1235_s21 }
  0x10   : > { %1823 = sst [smem:[#allocation12_spill]] %s1849_s25  ;;  %p1327_p3 = por %p67_p2, %p66_p1 }
  0x11   : > { %p72_p4 = scmp.ne.s32.totalorder %s1215_s16, %s1211_s15  ;;  %p44_p5 = scmp.ge.s32.totalorder %s1851_s26, 2 }
  0x12   : > { %p73_p6 = scmp.eq.s32.totalorder %s943_s23, 0  ;;  %p180_p7 = scmp.eq.s32.totalorder %s943_s23, 3 }
  0x13   : > { %p186_p8 = scmp.eq.s32.totalorder %s944_s24, 3  ;;  %s1853_s26 = smov (%p44_p5, %s1851_s26), 0 }
  0x14   : > { %1825 = sst [smem:[#allocation13_spill]] %s1853_s26  ;;  %p1335_p9 = por %p73_p6, %p72_p4 }
  0x15   : > { %p1339_p10 = por %p180_p7, %p66_p1  ;;  %s54_s5 = ssub.s32 %s1235_s21, %s1853_s26 }
  0x16   : > { %s1826_s29 = scalar_select %p1335_p9, 1, 0 }
  0x17   : > { %s1827_s30 = scalar_select %p1339_p10, 1, 0 }
  0x18   : > { %p1345_p11 = por %p186_p8, %p72_p4  ;;  %p57_p12 = scmp.eq.s32.totalorder %s54_s5, 0 }
  0x19   : > { %p984_p13 = scmp.lt.s32.totalorder %s1239_s22, 4  ;;  %s1351_s7 = sand.u32 1, %s1219_s17  }
  0x1a   : > { %s1828_s6 = scalar_select %p1345_p11, 1, 0 }
  0x1b   : > { %s1354_s8 = scalar_select %p57_p12, %s1219_s17, %s59_s27  }
  0x1c   : > { %s1816_s9 = sshll.u32 %s1351_s7, 9  ;;  %s1817_s10 = sshll.u32 %s1235_s21, 13 }
  0x1d   : > { %s1829_s0 = sld [smem:[#allocation14_spill]]  ;;  %s216_s14 = scalar_lea.vmem [#allocation3], %s1816_s9 }
  0x1e   : > { %s229_s23 = sshll.u32 %s216_s14, 4  ;;  %p1371_p0 = pnand %p984_p13, %p1327_p3  ;;  %s1367_s23 = int_to_ptr.vmem [resolvable:$true] %s229_s23 }
  0x1f   : > { %s213_s27 = scalar_lea.sflag [#allocation4], %s1351_s7 }
  0x20   : > { %p1079_p4 = pneg %p1371_p0 }
  0x23   : > { %s1363_s13 = scalar_lea.hbm %s1829_s0, %s1817_s10  ;;  %s1082_s28 = scalar_lea.hbm %s1829_s0, 16384 }
  0x24   : > { %s1077_s5 = scalar_lea.hbm %s1363_s13, 8192  ;;  %p1083_p3 = scmp.lt.u32.totalorder %s1363_s13, %s1829_s0 }
  0x25   : > { %p1078_p2 = scmp.ne.s32.totalorder %s1363_s13, %s1077_s5  ;;  %p1084_p7 = scmp.lt.u32.totalorder %s1082_s28, %s1077_s5 }
  0x26   : > { %p1086_p12 = scmp.lt.u32.totalorder %s1077_s5, %s1363_s13 }
  0x27   : > { %p1080_p5 = pnand %p1079_p4, %p1078_p2  ;;  %p1085_p8 = por %p1084_p7, %p1083_p3 }
  0x29   : > { %p1081_p6 = pneg %p1080_p5  ;;  %p1087_p13 = por %p1086_p12, %p1085_p8 }
  0x2b   : > { %p1088_p1 = pnand %p1087_p13, %p1081_p6 }
  0x2d   : > { %1091 = shalt.err (!%p1088_p1)
}
  0x2e   : > { %s1092_s10 = scalar_lea.vmem %s1367_s23, 8192  ;;  %s1241_s11 = smov [#allocation3]  }
  0x2f   : > { %p1093_p2 = scmp.ne.s32.totalorder %s1367_s23, %s1092_s10  ;;  %s1097_s12 = sshll.u32 %s1241_s11, 4  ;;  %s1098_s12 = int_to_ptr.vmem [resolvable:$false] %s1097_s12 }
  0x30   : > { %s1099_s9 = scalar_lea.vmem %s1098_s12, 16384  ;;  %p1100_p10 = scmp.lt.s32.totalorder %s1367_s23, %s1098_s12 }
  0x31   : > { %p1095_p5 = pnand %p1093_p2, %p1079_p4  ;;  %p1101_p3 = scmp.lt.s32.totalorder %s1099_s9, %s1092_s10 }
  0x33   : > { %p1096_p11 = pneg %p1095_p5  ;;  %p1102_p7 = por %p1101_p3, %p1100_p10 }
  0x35   : > { %p1103_p8 = pnand %p1102_p7, %p1096_p11 }
  0x37   : > { %1106 = shalt.err (!%p1103_p8)
}
  0x38   : > { %s1820_s5 = smov 2048   ;;  %s1243_s28 = smov 128  }
  0x39   : > { %976 = dma.hbm_to_vmem [thread:$0]  (!%p1371_p0), %s1363_s13, 8192, %s1367_s23, %s213_s27, %s1820_s5, %s1820_s5, %s1243_s28  }
  0x3a   : > { %p263_p10 = scmp.lt.s32.totalorder %s1239_s22, 5  ;;  %s1831_s10 = sshll.u32 %s1235_s21, 13 }
  0x3b   : > { %s1413_s12 = scalar_lea.hbm %s1812_s1, %s1831_s10  ;;  %p1832_p11 = scmp.ge.s32.totalorder %s1239_s22, 1 }
  0x3c   : > { %s1834_s0 = sshll.u32 %s1351_s7, 9  ;;  %s240_s13 = scalar_lea.sflag [#allocation7], %s1351_s7 }
  0x3d   : > { %p1417_p1 = pnand %p1832_p11, %p263_p10  ;;  %s243_s26 = scalar_lea.vmem [#allocation6], %s1834_s0 }
  0x3e   : > { %s255_s25 = sshll.u32 %s243_s26, 4  ;;  %s1107_s23 = scalar_lea.hbm %s1413_s12, 8192  ;;  %s1423_s25 = int_to_ptr.vmem [resolvable:$true] %s255_s25 }
  0x3f   : > { %p1108_p6 = scmp.ne.s32.totalorder %s1413_s12, %s1107_s23  ;;  %s1112_s14 = scalar_lea.hbm %s1812_s1, 16384 }
  0x40   : > { %p1113_p2 = scmp.lt.u32.totalorder %s1413_s12, %s1812_s1  ;;  %p1114_p5 = scmp.lt.u32.totalorder %s1112_s14, %s1107_s23 }
  0x41   : > { %p1110_p12 = pnand %p1108_p6, %p1079_p4  ;;  %p1116_p7 = scmp.lt.u32.totalorder %s1107_s23, %s1413_s12 }
  0x42   : > { %p1115_p3 = por %p1114_p5, %p1113_p2 }
  0x43   : > { %p1111_p13 = pneg %p1110_p12 }
  0x44   : > { %p1117_p8 = por %p1116_p7, %p1115_p3 }
  0x46   : > { %p1118_p10 = pnand %p1117_p8, %p1111_p13 }
  0x48   : > { %1121 = shalt.err (!%p1118_p10)
}
  0x49   : > { %s1122_s0 = scalar_lea.vmem %s1423_s25, 8192  ;;  %s1244_s26 = smov [#allocation6]  }
  0x4a   : > { %p1123_p11 = scmp.ne.s32.totalorder %s1423_s25, %s1122_s0  ;;  %s1127_s27 = sshll.u32 %s1244_s26, 4  ;;  %s1128_s27 = int_to_ptr.vmem [resolvable:$false] %s1127_s27 }
  0x4b   : > { %s1129_s5 = scalar_lea.vmem %s1128_s27, 16384  ;;  %p1130_p9 = scmp.lt.s32.totalorder %s1423_s25, %s1128_s27 }
  0x4c   : > { %p1125_p6 = pnand %p1123_p11, %p1079_p4  ;;  %p1131_p2 = scmp.lt.s32.totalorder %s1129_s5, %s1122_s0 }
  0x4e   : > { %p1126_p12 = pneg %p1125_p6  ;;  %p1132_p5 = por %p1131_p2, %p1130_p9 }
  0x50   : > { %p1133_p3 = pnand %p1132_p5, %p1126_p12 }
  0x52   : > { %1136 = shalt.err (!%p1133_p3)
}
  0x53   : > { %s1835_s23 = smov 2048   ;;  %267 = sbr.rel (%p1417_p1) target bundleno = 812 (0x32c), region = 36 }
  0x54   : > { %979 = dma.hbm_to_vmem [thread:$0]  (!%p1371_p0), %s1413_s12, 8192, %s1423_s25, %s240_s13, %s1835_s23, %s1835_s23, %s1243_s28  }
  0x55   : > { %s1457_s10 = sand.u32 (!%p1417_p1), 1, %s1215_s16   ;;  %p1836_p9 = scmp.ne.s32.totalorder (!%p1417_p1), %s1826_s29, 0 }
  0x56   : > { %s954_s14 = sshll.u32 (!%p1417_p1), %s1457_s10, 9  ;;  %s270_s11 = scalar_lea.sflag (!%p1417_p1), [#allocation4], %s1457_s10 }
  0x57   : > { %s1461_s24 = scalar_lea.vmem (!%p1417_p1), [#allocation3], %s954_s14 }
  0x5a   : > { %1198 = dma.done.wait (%p1836_p9), %s270_s11, 8192  }
  0x5b   : > { %1200 = vsyncadd (%p1836_p9), %s270_s11, 4294959104  ;;  %s279_s25 = scalar_lea.sflag [#allocation7], %s1457_s10  ;;  %s1468_s7 = scalar_lea.vmem [#allocation6], %s954_s14 }
  0x5c   : > { %1202 = dma.done.wait (%p1836_p9), %s279_s25, 8192  }
  0x5d   : > { %1204 = vsyncadd (%p1836_p9), %s279_s25, 4294959104  ;;  %s1474_s28 = scalar_lea.vmem [#allocation8], %s954_s14  ;;  %p957_p0 = scmp.ne.s32.totalorder %s1223_s18, 0 }
  0x5e   : > { %v338_v0 = vld [vmem:[%s1461_s24] sm:$0xff] (!%p957_p0)  ;;  %v339_v1 = vld [vmem:[%s1461_s24 + $0x8] sm:$0xff] (!%p957_p0)  ;;  %v340_v2 = vld [vmem:[%s1461_s24 + $0x10] sm:$0xff] (!%p957_p0)  ;;  %vm333_vm0 = vcmask (!%p957_p0), 7168   ;;  %vm518_vm1 = vcmask (!%p957_p0), 15360  }
  0x5f   : > { %328 = sbr.rel (%p957_p0) target bundleno = 620 (0x26c), region = 48  ;;  %v402_v3 = vmax.f32 (!%p957_p0), %v338_v0, %v339_v1  ;;  %v341_v4 = vld [vmem:[%s1461_s24 + $0x18] sm:$0xff] (!%p957_p0)  ;;  %v342_v6 = vld [vmem:[%s1461_s24 + $0x20] sm:$0xff] (!%p957_p0)  ;;  %v355_v9 = vld [vmem:[%s1461_s24 + $0x88] sm:$0xff] (!%p957_p0) }
  0x60   : > { %v354_v8 = vld [vmem:[%s1461_s24 + $0x80] sm:$0xff] (!%p957_p0)  ;;  %v343_v10 = vld [vmem:[%s1461_s24 + $0x28] sm:$0xff] (!%p957_p0)  ;;  %v356_v11 = vld [vmem:[%s1461_s24 + $0x90] sm:$0xff] (!%p957_p0) }
  0x61   : > { %v403_v5 = vmax.f32 (!%p957_p0), %v402_v3, %v340_v2  ;;  %v419_v12 = vmax.f32 (!%p957_p0), %v354_v8, %v355_v9  ;;  %v357_v14 = vld [vmem:[%s1461_s24 + $0x98] sm:$0xff] (!%p957_p0)  ;;  %v344_v15 = vld [vmem:[%s1461_s24 + $0x30] sm:$0xff] (!%p957_p0)  ;;  %v358_v18 = vld [vmem:[%s1461_s24 + $0xa0] sm:$0xff] (!%p957_p0) }
  0x62   : > { %v345_v19 = vld [vmem:[%s1461_s24 + $0x38] sm:$0xff] (!%p957_p0)  ;;  %v370_v21 = vld [vmem:[%s1461_s24 + $0x100] sm:$0xff] (!%p957_p0)  ;;  %v359_v23 = vld [vmem:[%s1461_s24 + $0xa8] sm:$0xff] (!%p957_p0) }
  0x63   : > { %v404_v7 = vmax.f32 (!%p957_p0), %v403_v5, %v341_v4  ;;  %v420_v16 = vmax.f32 (!%p957_p0), %v419_v12, %v356_v11  ;;  %v371_v24 = vld [vmem:[%s1461_s24 + $0x108] sm:$0xff] (!%p957_p0)  ;;  %v372_v25 = vld [vmem:[%s1461_s24 + $0x110] sm:$0xff] (!%p957_p0)  ;;  %v346_v26 = vld [vmem:[%s1461_s24 + $0x40] sm:$0xff] (!%p957_p0) }
  0x64   : > { %v436_v28 = vmax.f32 (!%p957_p0), %v370_v21, %v371_v24  ;;  %v360_v30 = vld [vmem:[%s1461_s24 + $0xb0] sm:$0xff] (!%p957_p0)  ;;  %v373_v31 = vld [vmem:[%s1461_s24 + $0x118] sm:$0xff] (!%p957_p0)  ;;  %v347_v32 = vld [vmem:[%s1461_s24 + $0x48] sm:$0xff] (!%p957_p0) }
  0x65   : > { %v405_v13 = vmax.f32 (!%p957_p0), %v404_v7, %v342_v6  ;;  %v421_v20 = vmax.f32 (!%p957_p0), %v420_v16, %v357_v14  ;;  %v348_v35 = vld [vmem:[%s1461_s24 + $0x50] sm:$0xff] (!%p957_p0)  ;;  %v361_v37 = vld [vmem:[%s1461_s24 + $0xb8] sm:$0xff] (!%p957_p0)  ;;  %v374_v38 = vld [vmem:[%s1461_s24 + $0x120] sm:$0xff] (!%p957_p0) }
  0x66   : > { %v437_v34 = vmax.f32 %v436_v28, %v372_v25  ;;  %v386_v41 = vld [vmem:[%s1461_s24 + $0x180] sm:$0xff]  ;;  %v387_v42 = vld [vmem:[%s1461_s24 + $0x188] sm:$0xff]  ;;  %v388_v43 = vld [vmem:[%s1461_s24 + $0x190] sm:$0xff] }
  0x67   : > { %v406_v17 = vmax.f32 %v405_v13, %v343_v10  ;;  %v422_v27 = vmax.f32 %v421_v20, %v358_v18  ;;  %v362_v45 = vld [vmem:[%s1461_s24 + $0xc0] sm:$0xff]  ;;  %v375_v46 = vld [vmem:[%s1461_s24 + $0x128] sm:$0xff]  ;;  %v453_v47 = vmax.f32 %v386_v41, %v387_v42  ;;  %v349_v48 = vld [vmem:[%s1461_s24 + $0x58] sm:$0xff] }
  0x68   : > { %v438_v40 = vmax.f32 %v437_v34, %v373_v31  ;;  %v389_v51 = vld [vmem:[%s1461_s24 + $0x198] sm:$0xff]  ;;  %v363_v53 = vld [vmem:[%s1461_s24 + $0xc8] sm:$0xff]  ;;  %v376_v54 = vld [vmem:[%s1461_s24 + $0x130] sm:$0xff] }
  0x69   : > { %v407_v22 = vmax.f32 %v406_v17, %v344_v15  ;;  %v423_v33 = vmax.f32 %v422_v27, %v359_v23  ;;  %v454_v55 = vmax.f32 %v453_v47, %v388_v43  ;;  %v350_v56 = vld [vmem:[%s1461_s24 + $0x60] sm:$0xff]  ;;  %v364_v61 = vld [vmem:[%s1461_s24 + $0xd0] sm:$0xff]  ;;  %v377_v62 = vld [vmem:[%s1461_s24 + $0x138] sm:$0xff] }
  0x6a   : > { %v439_v50 = vmax.f32 %v438_v40, %v374_v38  ;;  %v390_v59 = vld [vmem:[%s1461_s24 + $0x1a0] sm:$0xff]  ;;  %v351_v0 = vld [vmem:[%s1461_s24 + $0x68] sm:$0xff]  ;;  %v365_v5 = vld [vmem:[%s1461_s24 + $0xd8] sm:$0xff] }
  0x6b   : > { %v408_v29 = vmax.f32 %v407_v22, %v345_v19  ;;  %v424_v39 = vmax.f32 %v423_v33, %v360_v30  ;;  %v455_v63 = vmax.f32 %v454_v55, %v389_v51  ;;  %v391_v3 = vld [vmem:[%s1461_s24 + $0x1a8] sm:$0xff]  ;;  %v378_v6 = vld [vmem:[%s1461_s24 + $0x140] sm:$0xff]  ;;  %v352_v8 = vld [vmem:[%s1461_s24 + $0x70] sm:$0xff] }
  0x6c   : > { %v440_v58 = vmax.f32 %v439_v50, %v375_v46  ;;  %v392_v11 = vld [vmem:[%s1461_s24 + $0x1b0] sm:$0xff]  ;;  %v366_v13 = vld [vmem:[%s1461_s24 + $0xe0] sm:$0xff]  ;;  %v379_v14 = vld [vmem:[%s1461_s24 + $0x148] sm:$0xff] }
  0x6d   : > { %v409_v36 = vmax.f32 %v408_v29, %v346_v26  ;;  %v425_v49 = vmax.f32 %v424_v39, %v361_v37  ;;  %v456_v7 = vmax.f32 %v455_v63, %v390_v59  ;;  %v353_v16 = vld [vmem:[%s1461_s24 + $0x78] sm:$0xff]  ;;  %v367_v21 = vld [vmem:[%s1461_s24 + $0xe8] sm:$0xff]  ;;  %v380_v22 = vld [vmem:[%s1461_s24 + $0x150] sm:$0xff] }
  0x6e   : > { %v441_v2 = vmax.f32 %v440_v58, %v376_v54  ;;  %v393_v19 = vld [vmem:[%s1461_s24 + $0x1b8] sm:$0xff]  ;;  %v394_v26 = vld [vmem:[%s1461_s24 + $0x1c0] sm:$0xff]  ;;  %v368_v28 = vld [vmem:[%s1461_s24 + $0xf0] sm:$0xff] }
  0x6f   : > { %v410_v44 = vmax.f32 %v409_v36, %v347_v32  ;;  %v426_v57 = vmax.f32 %v425_v49, %v362_v45  ;;  %v457_v15 = vmax.f32 %v456_v7, %v391_v3  ;;  %v381_v29 = vld [vmem:[%s1461_s24 + $0x158] sm:$0xff]  ;;  %v395_v33 = vld [vmem:[%s1461_s24 + $0x1c8] sm:$0xff]  ;;  %v396_v39 = vld [vmem:[%s1461_s24 + $0x1d0] sm:$0xff] }
  0x70   : > { %v442_v10 = vmax.f32 %v441_v2, %v377_v62  ;;  %v369_v34 = vld [vmem:[%s1461_s24 + $0xf8] sm:$0xff]  ;;  %v383_v40 = vld [vmem:[%s1461_s24 + $0x168] sm:$0xff]  ;;  %v384_v45 = vld [vmem:[%s1461_s24 + $0x170] sm:$0xff] }
  0x71   : > { %v411_v52 = vmax.f32 %v410_v44, %v348_v35  ;;  %v427_v1 = vmax.f32 %v426_v57, %v363_v53  ;;  %v458_v23 = vmax.f32 %v457_v15, %v392_v11  ;;  %v382_v35 = vld [vmem:[%s1461_s24 + $0x160] sm:$0xff]  ;;  %v397_v44 = vld [vmem:[%s1461_s24 + $0x1d8] sm:$0xff]  ;;  %v400_v55 = vld [vmem:[%s1461_s24 + $0x1f0] sm:$0xff]  ;;  %v1245_v57 = vmov -inf  }
  0x72   : > { %v443_v18 = vmax.f32 %v442_v10, %v378_v6  ;;  %v385_v49 = vld [vmem:[%s1461_s24 + $0x178] sm:$0xff]  ;;  %334 = vst.msk [vmem:[#allocation2] sm:$0xff] %vm333_vm0, %v1245_v57  ;;  %335 = vst.msk [vmem:[#allocation2 + $0x8] sm:$0xff] %vm333_vm0, %v1245_v57  ;;  %v491_v15 = vld [vmem:[%s1813_s2 + $0x8] sm:$0xff] }
  0x73   : > { %v412_v60 = vmax.f32 %v411_v52, %v349_v48  ;;  %v428_v9 = vmax.f32 %v427_v1, %v364_v61  ;;  %v459_v30 = vmax.f32 %v458_v23, %v393_v19  ;;  %v398_v48 = vld [vmem:[%s1461_s24 + $0x1e0] sm:$0xff]  ;;  %v399_v52 = vld [vmem:[%s1461_s24 + $0x1e8] sm:$0xff]  ;;  %336 = vst.msk [vmem:[#allocation2 + $0x10] sm:$0xff] %vm333_vm0, %v1245_v57  ;;  %337 = vst.msk [vmem:[#allocation2 + $0x18] sm:$0xff] %vm333_vm0, %v1245_v57  ;;  %v1246_v61 = vmov 0  }
  0x74   : > { %v444_v25 = vmax.f32 %v443_v18, %v379_v14  ;;  %v401_v58 = vld [vmem:[%s1461_s24 + $0x1f8] sm:$0xff]  ;;  %1057 = vset.pattern.permute.xlu0 %v1246_v61  ;;  %1058 = vset.pattern.permute.xlu1 %v1246_v61  ;;  %v492_v19 = vld [vmem:[%s1813_s2 + $0x10] sm:$0xff] }
  0x75   : > { %v413_v4 = vmax.f32 %v412_v60, %v350_v56  ;;  %v429_v17 = vmax.f32 %v428_v9, %v365_v5  ;;  %v460_v36 = vmax.f32 %v459_v30, %v394_v26 }
  0x76   : > { %v445_v32 = vmax.f32 %v444_v25, %v380_v22 }
  0x77   : > { %v414_v12 = vmax.f32 %v413_v4, %v351_v0  ;;  %v430_v24 = vmax.f32 %v429_v17, %v366_v13  ;;  %v461_v41 = vmax.f32 %v460_v36, %v395_v33 }
  0x78   : > { %v446_v38 = vmax.f32 %v445_v32, %v381_v29 }
  0x79   : > { %v415_v20 = vmax.f32 %v414_v12, %v352_v8  ;;  %v431_v31 = vmax.f32 %v430_v24, %v367_v21  ;;  %v462_v46 = vmax.f32 %v461_v41, %v396_v39  ;;  %v470_v62 = vld [vmem:[#allocation2] sm:$0xff]  ;;  %v471_v1 = vld [vmem:[#allocation2 + $0x8] sm:$0xff]  ;;  %v493_v24 = vld [vmem:[%s1813_s2 + $0x18] sm:$0xff] }
  0x7a   : > { %v447_v43 = vmax.f32 %v446_v38, %v382_v35  ;;  %v472_v4 = vld [vmem:[#allocation2 + $0x10] sm:$0xff]  ;;  %v473_v8 = vld [vmem:[#allocation2 + $0x18] sm:$0xff]  ;;  %v534_v39 = vld [vmem:[%s1814_s3 + $0x8] sm:$0xff] }
  0x7b   : > { %v416_v27 = vmax.f32 %v415_v20, %v353_v16  ;;  %v432_v37 = vmax.f32 %v431_v31, %v368_v28  ;;  %v463_v50 = vmax.f32 %v462_v46, %v397_v44  ;;  %v490_v16 = vld [vmem:[%s1813_s2] sm:$0xff] }
  0x7c   : > { %v448_v47 = vmax.f32 %v447_v43, %v383_v40  ;;  %v533_v40 = vld [vmem:[%s1814_s3] sm:$0xff] }
  0x7d   : > { %417 = vmax.xlane.f32.xlu0 %v416_v27  ;;  %v433_v42 = vmax.f32 %v432_v37, %v369_v34  ;;  %v464_v53 = vmax.f32 %v463_v50, %v398_v48  ;;  %v536_v48 = vld [vmem:[%s1814_s3 + $0x18] sm:$0xff] }
  0x7e   : > { %v449_v51 = vmax.f32 %v448_v47, %v384_v45 }
  0x7f   : > { %v465_v56 = vmax.f32 %v464_v53, %v399_v52 }
  0x80   : > { %v450_v54 = vmax.f32 %v449_v51, %v385_v49 }
  0x81   : > { %434 = vmax.xlane.f32.xlu0 %v433_v42  ;;  %v466_v59 = vmax.f32 %v465_v56, %v400_v55  ;;  %v535_v42 = vld [vmem:[%s1814_s3 + $0x10] sm:$0xff] }
  0x82   : > { %451 = vmax.xlane.f32.xlu1 %v450_v54 }
  0x83   : > { %v467_v60 = vmax.f32 %v466_v59, %v401_v58 }
  0x86   : > { %468 = vmax.xlane.f32.xlu1 %v467_v60 }
 0x10a   : > { %v418_v63 = vpop.xlane.xlu0 %417 }
 0x10b   : > { %v474_v0 = vmax.f32 %v470_v62, %v418_v63 }
 0x10d   : > { %479 = vst.msk [vmem:[#allocation2] sm:$0xff] %vm333_vm0, %v474_v0 }
 0x10e   : > { %v435_v2 = vpop.xlane.xlu0 %434 }
 0x10f   : > { %v475_v3 = vmax.f32 %v471_v1, %v435_v2  ;;  %v452_v6 = vpop.xlane.xlu1 %451 }
 0x110   : > { %v476_v7 = vmax.f32 %v472_v4, %v452_v6 }
 0x111   : > { %480 = vst.msk [vmem:[#allocation2 + $0x8] sm:$0xff] %vm333_vm0, %v475_v3 }
 0x112   : > { %481 = vst.msk [vmem:[#allocation2 + $0x10] sm:$0xff] %vm333_vm0, %v476_v7 }
 0x113   : > { %v469_v10 = vpop.xlane.xlu1 %468 }
 0x114   : > { %v486_v5 = vld [vmem:[#allocation2] sm:$0xff]  ;;  %v477_v11 = vmax.f32 %v473_v8, %v469_v10 }
 0x115   : > { %496 = vperm.xlu0 %1057, %v486_v5  }
 0x116   : > { %482 = vst.msk [vmem:[#allocation2 + $0x18] sm:$0xff] %vm333_vm0, %v477_v11 }
 0x118   : > { %v487_v9 = vld [vmem:[#allocation2 + $0x8] sm:$0xff] }
 0x119   : > { %501 = vperm.xlu1 %1058, %v487_v9   ;;  %v488_v12 = vld [vmem:[#allocation2 + $0x10] sm:$0xff] }
 0x11d   : > { %506 = vperm.xlu1 %1058, %v488_v12   ;;  %v489_v13 = vld [vmem:[#allocation2 + $0x18] sm:$0xff] }
 0x121   : > { %511 = vperm.xlu1 %1058, %v489_v13  }
 0x194   : > { %v497_v17 = vpop.permute.xlu0 %496 }
 0x195   : > { %v514_v20 = vmul.f32 %v497_v17, %v490_v16 }
 0x197   : > { %v519_v25 = vsel %vm518_vm1, %v514_v20, 0.0 }
 0x198   : > { %v502_v14 = vpop.permute.xlu1 %501 }
 0x199   : > { %v515_v18 = vmul.f32 %v502_v14, %v491_v15 }
 0x19b   : > { %v520_v23 = vsel %vm518_vm1, %v515_v18, 0.0 }
 0x19c   : > { %v507_v21 = vpop.permute.xlu1 %506  ;;  %v521_v27 = vadd.f32 %v520_v23, %v519_v25 }
 0x19d   : > { %v516_v22 = vmul.f32 %v507_v21, %v492_v19 }
 0x19f   : > { %v522_v26 = vsel %vm518_vm1, %v516_v22, 0.0 }
 0x1a0   : > { %v512_v28 = vpop.permute.xlu1 %511  ;;  %v523_v30 = vadd.f32 %v522_v26, %v521_v27 }
 0x1a1   : > { %v517_v29 = vmul.f32 %v512_v28, %v493_v24 }
 0x1a3   : > { %v524_v31 = vsel %vm518_vm1, %v517_v29, 0.0 }
 0x1a4   : > { %v525_v32 = vadd.f32 %v524_v31, %v523_v30 }
 0x1a6   : > { %v526_v33 = vrot.slane %v525_v32, 4 }
 0x1a8   : > { %v527_v34 = vadd.f32 %v526_v33, %v525_v32 }
 0x1aa   : > { %v528_v35 = vrot.slane %v527_v34, 2 }
 0x1ac   : > { %v529_v36 = vadd.f32 %v528_v35, %v527_v34 }
 0x1ae   : > { %v530_v37 = vrot.slane %v529_v36, 1 }
 0x1b0   : > { %v531_v38 = vadd.f32 %v530_v37, %v529_v36 }
 0x1b2   : > { %v532_v41 = vmax.f32 %v531_v38, 0.0 }
 0x1b4   : > { %v538_v43 = vmul.f32 %v534_v39, %v532_v41  ;;  %v537_v44 = vmul.f32 %v533_v40, %v532_v41  ;;  %v539_v47 = vmul.f32 %v535_v42, %v532_v41  ;;  %v540_v50 = vmul.f32 %v536_v48, %v532_v41 }
 0x1b6   : > { %v544_v45 = vsel %vm518_vm1, %v538_v43, 0.0  ;;  %v541_v46 = vsel %vm518_vm1, %v537_v44, 0.0  ;;  %v547_v49 = vsel %vm518_vm1, %v539_v47, 0.0  ;;  %v550_v51 = vsel %vm518_vm1, %v540_v50, 0.0 }
 0x1b7   : > { %545 = vadd.xlane.f32.xlu0 %v544_v45  ;;  %542 = vadd.xlane.f32.xlu1 %v541_v46 }
 0x1bb   : > { %548 = vadd.xlane.f32.xlu1 %v547_v49 }
 0x1bf   : > { %551 = vadd.xlane.f32.xlu1 %v550_v51 }
 0x244   : > { %v546_v52 = vpop.xlane.xlu0 %545  ;;  %v543_v53 = vpop.xlane.xlu1 %542 }
 0x245   : > { %v554_v54 = vsub.f32 0.0, %v546_v52  ;;  %v553_v55 = vsub.f32 0.0, %v543_v53 }
 0x247   : > { %v559_v56 = vmul.f32 1.442695, %v554_v54  ;;  %v557_v57 = vmul.f32 1.442695, %v553_v55 }
 0x248   : > { %v549_v58 = vpop.xlane.xlu1 %548 }
 0x249   : > { %1059 = vpow2.f32 %v559_v56  ;;  %v555_v59 = vsub.f32 0.0, %v549_v58 }
 0x24a   : > { %1061 = vpow2.f32 %v557_v57 }
 0x24b   : > { %v561_v60 = vmul.f32 1.442695, %v555_v59 }
 0x24c   : > { %v552_v61 = vpop.xlane.xlu1 %551 }
 0x24d   : > { %1063 = vpow2.f32 %v561_v60  ;;  %v556_v62 = vsub.f32 0.0, %v552_v61 }
 0x24f   : > { %v563_v63 = vmul.f32 1.442695, %v556_v62 }
 0x251   : > { %1065 = vpow2.f32 %v563_v63 }
 0x253   : > { %v1060_v0 = vpop.eup %1059 }
 0x254   : > { %v1062_v1 = vpop.eup %1061  ;;  %v566_v2 = vadd.f32 1.0, %v1060_v0 }
 0x255   : > { %v565_v3 = vadd.f32 1.0, %v1062_v1 }
 0x256   : > { %1067 = vrcp.f32 %v566_v2 }
 0x257   : > { %v1064_v4 = vpop.eup %1063  ;;  %1069 = vrcp.f32 %v565_v3 }
 0x258   : > { %v567_v5 = vadd.f32 1.0, %v1064_v4 }
 0x25a   : > { %1071 = vrcp.f32 %v567_v5 }
 0x25b   : > { %v1066_v6 = vpop.eup %1065 }
 0x25c   : > { %v568_v7 = vadd.f32 1.0, %v1066_v6 }
 0x25e   : > { %1073 = vrcp.f32 %v568_v7 }
 0x260   : > { %v1068_v8 = vpop.eup %1067 }
 0x261   : > { %v1070_v9 = vpop.eup %1069  ;;  %v578_v10 = vadd.f32 1.0, %v1068_v8 }
 0x262   : > { %v577_v11 = vadd.f32 1.0, %v1070_v9 }
 0x263   : > { %582 = vst.msk [vmem:[#allocation2 + $0x8] sm:$0xff] %vm333_vm0, %v578_v10 }
 0x264   : > { %v1072_v12 = vpop.eup %1071  ;;  %581 = vst.msk [vmem:[#allocation2] sm:$0xff] %vm333_vm0, %v577_v11 }
 0x265   : > { %v579_v13 = vadd.f32 1.0, %v1072_v12 }
 0x267   : > { %583 = vst.msk [vmem:[#allocation2 + $0x10] sm:$0xff] %vm333_vm0, %v579_v13 }
 0x268   : > { %v1074_v14 = vpop.eup %1073 }
 0x269   : > { %v580_v15 = vadd.f32 1.0, %v1074_v14 }
 0x26b   : > { %584 = vst.msk [vmem:[#allocation2 + $0x18] sm:$0xff] %vm333_vm0, %v580_v15 }
 0x26c PF: > { %p958_p4 = scmp.ne.s32.totalorder %s1223_s18, 1 }
 0x26d   : > { %v653_v17 = vld [vmem:[#allocation2] sm:$0xff] (!%p958_p4)  ;;  %v1247_v18 = vmov (!%p958_p4), 0   ;;  %v654_v20 = vld [vmem:[#allocation2 + $0x8] sm:$0xff] (!%p958_p4)  ;;  %v623_v23 = vld [vmem:[%s1468_s7 + $0x110] sm:$0xff] (!%p958_p4) }
 0x26e   : > { %588 = sbr.rel (%p958_p4) target bundleno = 786 (0x312), region = 60  ;;  %v655_v16 = vld [vmem:[#allocation2 + $0x10] sm:$0xff] (!%p958_p4)  ;;  %1076 = vset.pattern.permute.xlu1 (!%p958_p4), %v1247_v18  ;;  %1075 = vset.pattern.permute.xlu0 (!%p958_p4), %v1247_v18  ;;  %v621_v21 = vld [vmem:[%s1468_s7 + $0x100] sm:$0xff] (!%p958_p4)  ;;  %v622_v22 = vld [vmem:[%s1468_s7 + $0x108] sm:$0xff] (!%p958_p4) }
 0x26f   : > { %669 = vperm.xlu1 (!%p958_p4), %1076, %v655_v16   ;;  %659 = vperm.xlu0 (!%p958_p4), %1075, %v653_v17   ;;  %v624_v24 = vld [vmem:[%s1468_s7 + $0x118] sm:$0xff] (!%p958_p4)  ;;  %v625_v25 = vld [vmem:[%s1468_s7 + $0x120] sm:$0xff] (!%p958_p4)  ;;  %v626_v26 = vld [vmem:[%s1468_s7 + $0x128] sm:$0xff] (!%p958_p4) }
 0x270   : > { %v627_v27 = vld [vmem:[%s1468_s7 + $0x130] sm:$0xff] (!%p958_p4)  ;;  %v628_v28 = vld [vmem:[%s1468_s7 + $0x138] sm:$0xff] (!%p958_p4)  ;;  %v629_v29 = vld [vmem:[%s1468_s7 + $0x140] sm:$0xff] (!%p958_p4) }
 0x271   : > { %v630_v30 = vld [vmem:[%s1468_s7 + $0x148] sm:$0xff] (!%p958_p4)  ;;  %v631_v31 = vld [vmem:[%s1468_s7 + $0x150] sm:$0xff] (!%p958_p4)  ;;  %v632_v32 = vld [vmem:[%s1468_s7 + $0x158] sm:$0xff] (!%p958_p4) }
 0x272   : > { %v656_v19 = vld [vmem:[#allocation2 + $0x18] sm:$0xff] (!%p958_p4)  ;;  %v633_v33 = vld [vmem:[%s1468_s7 + $0x160] sm:$0xff] (!%p958_p4)  ;;  %v634_v34 = vld [vmem:[%s1468_s7 + $0x168] sm:$0xff] (!%p958_p4) }
 0x273   : > { %674 = vperm.xlu1 (!%p958_p4), %1076, %v656_v19   ;;  %664 = vperm.xlu0 (!%p958_p4), %1075, %v654_v20   ;;  %v635_v35 = vld [vmem:[%s1468_s7 + $0x170] sm:$0xff] (!%p958_p4)  ;;  %v636_v36 = vld [vmem:[%s1468_s7 + $0x178] sm:$0xff] (!%p958_p4)  ;;  %v589_v38 = vld [vmem:[%s1468_s7] sm:$0xff] (!%p958_p4) }
 0x274   : > { %v590_v39 = vld [vmem:[%s1468_s7 + $0x8] sm:$0xff] (!%p958_p4)  ;;  %v591_v40 = vld [vmem:[%s1468_s7 + $0x10] sm:$0xff] (!%p958_p4)  ;;  %v592_v41 = vld [vmem:[%s1468_s7 + $0x18] sm:$0xff] (!%p958_p4) }
 0x275   : > { %v593_v46 = vld [vmem:[%s1468_s7 + $0x20] sm:$0xff]  ;;  %v594_v47 = vld [vmem:[%s1468_s7 + $0x28] sm:$0xff]  ;;  %v595_v48 = vld [vmem:[%s1468_s7 + $0x30] sm:$0xff] }
 0x276   : > { %v596_v49 = vld [vmem:[%s1468_s7 + $0x38] sm:$0xff]  ;;  %v597_v55 = vld [vmem:[%s1468_s7 + $0x40] sm:$0xff]  ;;  %v598_v56 = vld [vmem:[%s1468_s7 + $0x48] sm:$0xff] }
 0x277   : > { %v599_v57 = vld [vmem:[%s1468_s7 + $0x50] sm:$0xff]  ;;  %v600_v58 = vld [vmem:[%s1468_s7 + $0x58] sm:$0xff]  ;;  %v601_v63 = vld [vmem:[%s1468_s7 + $0x60] sm:$0xff] }
 0x278   : > { %v602_v0 = vld [vmem:[%s1468_s7 + $0x68] sm:$0xff]  ;;  %v603_v1 = vld [vmem:[%s1468_s7 + $0x70] sm:$0xff]  ;;  %v604_v2 = vld [vmem:[%s1468_s7 + $0x78] sm:$0xff] }
 0x279   : > { %v637_v7 = vld [vmem:[%s1468_s7 + $0x180] sm:$0xff]  ;;  %v638_v8 = vld [vmem:[%s1468_s7 + $0x188] sm:$0xff]  ;;  %v639_v9 = vld [vmem:[%s1468_s7 + $0x190] sm:$0xff] }
 0x27a   : > { %v640_v10 = vld [vmem:[%s1468_s7 + $0x198] sm:$0xff]  ;;  %v641_v15 = vld [vmem:[%s1468_s7 + $0x1a0] sm:$0xff]  ;;  %v642_v16 = vld [vmem:[%s1468_s7 + $0x1a8] sm:$0xff] }
 0x27b   : > { %v643_v17 = vld [vmem:[%s1468_s7 + $0x1b0] sm:$0xff]  ;;  %v644_v18 = vld [vmem:[%s1468_s7 + $0x1b8] sm:$0xff] }
 0x2ee   : > { %v670_v37 = vpop.permute.xlu1 %669  ;;  %v1610_v54 = vpop.permute.xlu0 %659 }
 0x2ef   : > { %v709_v42 = vmul.f32 %v670_v37, %v621_v21  ;;  %v710_v43 = vmul.f32 %v670_v37, %v622_v22  ;;  %v711_v44 = vmul.f32 %v670_v37, %v623_v23  ;;  %v712_v45 = vmul.f32 %v670_v37, %v624_v24  ;;  %v645_v24 = vld [vmem:[%s1468_s7 + $0x1c0] sm:$0xff] }
 0x2f0   : > { %v713_v50 = vmul.f32 %v670_v37, %v625_v25  ;;  %v714_v51 = vmul.f32 %v670_v37, %v626_v26  ;;  %v715_v52 = vmul.f32 %v670_v37, %v627_v27  ;;  %v716_v53 = vmul.f32 %v670_v37, %v628_v28  ;;  %v646_v25 = vld [vmem:[%s1468_s7 + $0x1c8] sm:$0xff]  ;;  %v647_v26 = vld [vmem:[%s1468_s7 + $0x1d0] sm:$0xff] }
 0x2f1   : > { %v717_v59 = vmul.f32 %v670_v37, %v629_v29  ;;  %v718_v60 = vmul.f32 %v670_v37, %v630_v30  ;;  %v719_v61 = vmul.f32 %v670_v37, %v631_v31  ;;  %v720_v62 = vmul.f32 %v670_v37, %v632_v32  ;;  %773 = vst [vmem:[%s1474_s28 + $0x100] sm:$0xff] %v709_v42  ;;  %v648_v31 = vld [vmem:[%s1468_s7 + $0x1d8] sm:$0xff]  ;;  %v649_v32 = vld [vmem:[%s1468_s7 + $0x1e0] sm:$0xff] }
 0x2f2   : > { %774 = vst [vmem:[%s1474_s28 + $0x108] sm:$0xff] %v710_v43  ;;  %775 = vst [vmem:[%s1474_s28 + $0x110] sm:$0xff] %v711_v44  ;;  %v721_v3 = vmul.f32 %v670_v37, %v633_v33  ;;  %v722_v4 = vmul.f32 %v670_v37, %v634_v34  ;;  %v723_v5 = vmul.f32 %v670_v37, %v635_v35  ;;  %v1652_v23 = vpop.permute.xlu1 %674  ;;  %v650_v33 = vld [vmem:[%s1468_s7 + $0x1e8] sm:$0xff] }
 0x2f3   : > { %776 = vst [vmem:[%s1474_s28 + $0x118] sm:$0xff] %v712_v45  ;;  %v724_v6 = vmul.f32 %v670_v37, %v636_v36  ;;  %777 = vst [vmem:[%s1474_s28 + $0x120] sm:$0xff] %v713_v50  ;;  %v677_v11 = vmul.f32 %v1610_v54, %v589_v38  ;;  %v678_v12 = vmul.f32 %v1610_v54, %v590_v39  ;;  %v651_v38 = vld [vmem:[%s1468_s7 + $0x1f0] sm:$0xff]  ;;  %v652_v39 = vld [vmem:[%s1468_s7 + $0x1f8] sm:$0xff] }
 0x2f4   : > { %778 = vst [vmem:[%s1474_s28 + $0x128] sm:$0xff] %v714_v51  ;;  %779 = vst [vmem:[%s1474_s28 + $0x130] sm:$0xff] %v715_v52  ;;  %v679_v13 = vmul.f32 %v1610_v54, %v591_v40  ;;  %v680_v14 = vmul.f32 %v1610_v54, %v592_v41  ;;  %v681_v19 = vmul.f32 %v1610_v54, %v593_v46  ;;  %v605_v40 = vld [vmem:[%s1468_s7 + $0x80] sm:$0xff]  ;;  %v606_v45 = vld [vmem:[%s1468_s7 + $0x88] sm:$0xff]  ;;  %v665_v52 = vpop.permute.xlu0 %664 }
 0x2f5   : > { %780 = vst [vmem:[%s1474_s28 + $0x138] sm:$0xff] %v716_v53  ;;  %781 = vst [vmem:[%s1474_s28 + $0x140] sm:$0xff] %v717_v59  ;;  %v682_v20 = vmul.f32 %v1610_v54, %v594_v47  ;;  %v683_v21 = vmul.f32 %v1610_v54, %v595_v48  ;;  %v684_v22 = vmul.f32 %v1610_v54, %v596_v49  ;;  %v607_v46 = vld [vmem:[%s1468_s7 + $0x90] sm:$0xff]  ;;  %v608_v47 = vld [vmem:[%s1468_s7 + $0x98] sm:$0xff] }
 0x2f6   : > { %782 = vst [vmem:[%s1474_s28 + $0x148] sm:$0xff] %v718_v60  ;;  %783 = vst [vmem:[%s1474_s28 + $0x150] sm:$0xff] %v719_v61  ;;  %v685_v27 = vmul.f32 %v1610_v54, %v597_v55  ;;  %v686_v28 = vmul.f32 %v1610_v54, %v598_v56  ;;  %v687_v29 = vmul.f32 %v1610_v54, %v599_v57  ;;  %v609_v53 = vld [vmem:[%s1468_s7 + $0xa0] sm:$0xff]  ;;  %v611_v55 = vld [vmem:[%s1468_s7 + $0xb0] sm:$0xff] }
 0x2f7   : > { %784 = vst [vmem:[%s1474_s28 + $0x158] sm:$0xff] %v720_v62  ;;  %785 = vst [vmem:[%s1474_s28 + $0x160] sm:$0xff] %v721_v3  ;;  %v688_v30 = vmul.f32 %v1610_v54, %v600_v58  ;;  %v689_v34 = vmul.f32 %v1610_v54, %v601_v63  ;;  %v690_v35 = vmul.f32 %v1610_v54, %v602_v0  ;;  %v612_v60 = vld [vmem:[%s1468_s7 + $0xb8] sm:$0xff]  ;;  %v613_v61 = vld [vmem:[%s1468_s7 + $0xc0] sm:$0xff] }
 0x2f8   : > { %786 = vst [vmem:[%s1474_s28 + $0x168] sm:$0xff] %v722_v4  ;;  %787 = vst [vmem:[%s1474_s28 + $0x170] sm:$0xff] %v723_v5  ;;  %v691_v36 = vmul.f32 %v1610_v54, %v603_v1  ;;  %v692_v37 = vmul.f32 %v1610_v54, %v604_v2  ;;  %v725_v41 = vmul.f32 %v1652_v23, %v637_v7  ;;  %v610_v54 = vld [vmem:[%s1468_s7 + $0xa8] sm:$0xff]  ;;  %v615_v3 = vld [vmem:[%s1468_s7 + $0xd0] sm:$0xff] }
 0x2f9   : > { %788 = vst [vmem:[%s1474_s28 + $0x178] sm:$0xff] %v724_v6  ;;  %741 = vst [vmem:[%s1474_s28] sm:$0xff] %v677_v11  ;;  %v726_v42 = vmul.f32 %v1652_v23, %v638_v8  ;;  %v727_v43 = vmul.f32 %v1652_v23, %v639_v9  ;;  %v728_v44 = vmul.f32 %v1652_v23, %v640_v10  ;;  %v614_v62 = vld [vmem:[%s1468_s7 + $0xc8] sm:$0xff]  ;;  %v616_v4 = vld [vmem:[%s1468_s7 + $0xd8] sm:$0xff] }
 0x2fa   : > { %742 = vst [vmem:[%s1474_s28 + $0x8] sm:$0xff] %v678_v12  ;;  %743 = vst [vmem:[%s1474_s28 + $0x10] sm:$0xff] %v679_v13  ;;  %v729_v48 = vmul.f32 %v1652_v23, %v641_v15  ;;  %v730_v49 = vmul.f32 %v1652_v23, %v642_v16  ;;  %v731_v50 = vmul.f32 %v1652_v23, %v643_v17  ;;  %v617_v5 = vld [vmem:[%s1468_s7 + $0xe0] sm:$0xff]  ;;  %v618_v6 = vld [vmem:[%s1468_s7 + $0xe8] sm:$0xff] }
 0x2fb   : > { %744 = vst [vmem:[%s1474_s28 + $0x18] sm:$0xff] %v680_v14  ;;  %745 = vst [vmem:[%s1474_s28 + $0x20] sm:$0xff] %v681_v19  ;;  %v732_v51 = vmul.f32 %v1652_v23, %v644_v18  ;;  %v733_v56 = vmul.f32 %v1652_v23, %v645_v24  ;;  %v734_v57 = vmul.f32 %v1652_v23, %v646_v25  ;;  %v619_v7 = vld [vmem:[%s1468_s7 + $0xf0] sm:$0xff]  ;;  %v620_v8 = vld [vmem:[%s1468_s7 + $0xf8] sm:$0xff] }
 0x2fc   : > { %746 = vst [vmem:[%s1474_s28 + $0x28] sm:$0xff] %v682_v20  ;;  %747 = vst [vmem:[%s1474_s28 + $0x30] sm:$0xff] %v683_v21  ;;  %v735_v58 = vmul.f32 %v1652_v23, %v647_v26  ;;  %v736_v59 = vmul.f32 %v1652_v23, %v648_v31  ;;  %v737_v63 = vmul.f32 %v1652_v23, %v649_v32 }
 0x2fd   : > { %748 = vst [vmem:[%s1474_s28 + $0x38] sm:$0xff] %v684_v22  ;;  %749 = vst [vmem:[%s1474_s28 + $0x40] sm:$0xff] %v685_v27  ;;  %v738_v0 = vmul.f32 %v1652_v23, %v650_v33  ;;  %v739_v1 = vmul.f32 %v1652_v23, %v651_v38  ;;  %v740_v2 = vmul.f32 %v1652_v23, %v652_v39 }
 0x2fe   : > { %750 = vst [vmem:[%s1474_s28 + $0x48] sm:$0xff] %v686_v28  ;;  %751 = vst [vmem:[%s1474_s28 + $0x50] sm:$0xff] %v687_v29  ;;  %v693_v9 = vmul.f32 %v665_v52, %v605_v40  ;;  %v694_v10 = vmul.f32 %v665_v52, %v606_v45  ;;  %v695_v11 = vmul.f32 %v665_v52, %v607_v46 }
 0x2ff   : > { %752 = vst [vmem:[%s1474_s28 + $0x58] sm:$0xff] %v688_v30  ;;  %753 = vst [vmem:[%s1474_s28 + $0x60] sm:$0xff] %v689_v34  ;;  %v696_v12 = vmul.f32 %v665_v52, %v608_v47  ;;  %v697_v13 = vmul.f32 %v665_v52, %v609_v53  ;;  %v698_v14 = vmul.f32 %v665_v52, %v610_v54 }
 0x300   : > { %754 = vst [vmem:[%s1474_s28 + $0x68] sm:$0xff] %v690_v35  ;;  %755 = vst [vmem:[%s1474_s28 + $0x70] sm:$0xff] %v691_v36  ;;  %v699_v15 = vmul.f32 %v665_v52, %v611_v55  ;;  %v700_v16 = vmul.f32 %v665_v52, %v612_v60  ;;  %v701_v17 = vmul.f32 %v665_v52, %v613_v61 }
 0x301   : > { %756 = vst [vmem:[%s1474_s28 + $0x78] sm:$0xff] %v692_v37  ;;  %789 = vst [vmem:[%s1474_s28 + $0x180] sm:$0xff] %v725_v41  ;;  %v702_v18 = vmul.f32 %v665_v52, %v614_v62  ;;  %v703_v19 = vmul.f32 %v665_v52, %v615_v3  ;;  %v704_v20 = vmul.f32 %v665_v52, %v616_v4 }
 0x302   : > { %790 = vst [vmem:[%s1474_s28 + $0x188] sm:$0xff] %v726_v42  ;;  %791 = vst [vmem:[%s1474_s28 + $0x190] sm:$0xff] %v727_v43  ;;  %v705_v21 = vmul.f32 %v665_v52, %v617_v5  ;;  %v706_v22 = vmul.f32 %v665_v52, %v618_v6  ;;  %v707_v23 = vmul.f32 %v665_v52, %v619_v7 }
 0x303   : > { %792 = vst [vmem:[%s1474_s28 + $0x198] sm:$0xff] %v728_v44  ;;  %793 = vst [vmem:[%s1474_s28 + $0x1a0] sm:$0xff] %v729_v48  ;;  %v708_v24 = vmul.f32 %v665_v52, %v620_v8 }
 0x304   : > { %794 = vst [vmem:[%s1474_s28 + $0x1a8] sm:$0xff] %v730_v49  ;;  %795 = vst [vmem:[%s1474_s28 + $0x1b0] sm:$0xff] %v731_v50 }
 0x305   : > { %796 = vst [vmem:[%s1474_s28 + $0x1b8] sm:$0xff] %v732_v51  ;;  %797 = vst [vmem:[%s1474_s28 + $0x1c0] sm:$0xff] %v733_v56 }
 0x306   : > { %798 = vst [vmem:[%s1474_s28 + $0x1c8] sm:$0xff] %v734_v57  ;;  %799 = vst [vmem:[%s1474_s28 + $0x1d0] sm:$0xff] %v735_v58 }
 0x307   : > { %800 = vst [vmem:[%s1474_s28 + $0x1d8] sm:$0xff] %v736_v59  ;;  %801 = vst [vmem:[%s1474_s28 + $0x1e0] sm:$0xff] %v737_v63 }
 0x308   : > { %802 = vst [vmem:[%s1474_s28 + $0x1e8] sm:$0xff] %v738_v0  ;;  %803 = vst [vmem:[%s1474_s28 + $0x1f0] sm:$0xff] %v739_v1 }
 0x309   : > { %804 = vst [vmem:[%s1474_s28 + $0x1f8] sm:$0xff] %v740_v2  ;;  %757 = vst [vmem:[%s1474_s28 + $0x80] sm:$0xff] %v693_v9 }
 0x30a   : > { %758 = vst [vmem:[%s1474_s28 + $0x88] sm:$0xff] %v694_v10  ;;  %759 = vst [vmem:[%s1474_s28 + $0x90] sm:$0xff] %v695_v11 }
 0x30b   : > { %760 = vst [vmem:[%s1474_s28 + $0x98] sm:$0xff] %v696_v12  ;;  %761 = vst [vmem:[%s1474_s28 + $0xa0] sm:$0xff] %v697_v13 }
 0x30c   : > { %762 = vst [vmem:[%s1474_s28 + $0xa8] sm:$0xff] %v698_v14  ;;  %763 = vst [vmem:[%s1474_s28 + $0xb0] sm:$0xff] %v699_v15 }
 0x30d   : > { %764 = vst [vmem:[%s1474_s28 + $0xb8] sm:$0xff] %v700_v16  ;;  %765 = vst [vmem:[%s1474_s28 + $0xc0] sm:$0xff] %v701_v17 }
 0x30e   : > { %766 = vst [vmem:[%s1474_s28 + $0xc8] sm:$0xff] %v702_v18  ;;  %767 = vst [vmem:[%s1474_s28 + $0xd0] sm:$0xff] %v703_v19 }
 0x30f   : > { %768 = vst [vmem:[%s1474_s28 + $0xd8] sm:$0xff] %v704_v20  ;;  %769 = vst [vmem:[%s1474_s28 + $0xe0] sm:$0xff] %v705_v21 }
 0x310   : > { %770 = vst [vmem:[%s1474_s28 + $0xe8] sm:$0xff] %v706_v22  ;;  %771 = vst [vmem:[%s1474_s28 + $0xf0] sm:$0xff] %v707_v23 }
 0x311   : > { %772 = vst [vmem:[%s1474_s28 + $0xf8] sm:$0xff] %v708_v24 }
 0x312 PF: > { %s966_s18 = sshll.u32 %s1227_s19, 13  ;;  %s824_s26 = sshll.u32 %s1474_s28, 4  ;;  %s1757_s26 = int_to_ptr.vmem [resolvable:$true] %s824_s26 }
 0x313   : > { %s1754_s0 = scalar_lea.hbm %s1815_s4, %s966_s18  ;;  %s806_s27 = scalar_lea.sflag [#allocation5], %s1457_s10 }
 0x314   : > { %s1137_s5 = scalar_lea.vmem %s1757_s26, 8192  ;;  %p1837_p13 = scmp.ne.s32.totalorder %s1827_s30, 0 }
 0x315   : > { %p1138_p1 = scmp.ne.s32.totalorder %s1757_s26, %s1137_s5  ;;  %s1248_s23 = smov [#allocation8]  }
 0x316   : > { %s1141_s14 = sshll.u32 %s1248_s23, 4  ;;  %s1142_s14 = int_to_ptr.vmem [resolvable:$false] %s1141_s14 }
 0x317   : > { %p1139_p7 = pnand %p1138_p1, %p1837_p13  ;;  %s1143_s19 = scalar_lea.vmem %s1142_s14, 16384 }
 0x318   : > { %p1144_p10 = scmp.lt.s32.totalorder %s1757_s26, %s1142_s14  ;;  %p1145_p11 = scmp.lt.s32.totalorder %s1143_s19, %s1137_s5 }
 0x319   : > { %p1140_p8 = pneg %p1139_p7 }
 0x31a   : > { %p1146_p6 = por %p1145_p11, %p1144_p10 }
 0x31c   : > { %p1147_p12 = pnand %p1146_p6, %p1140_p8 }
 0x31e   : > { %1150 = shalt.err (!%p1147_p12)
}
 0x31f   : > { %s1151_s28 = scalar_lea.hbm %s1754_s0, 8192  ;;  %s1155_s25 = scalar_lea.hbm %s1815_s4, 16384 }
 0x320   : > { %p1152_p2 = scmp.ne.s32.totalorder %s1754_s0, %s1151_s28  ;;  %p1156_p9 = scmp.lt.u32.totalorder %s1754_s0, %s1815_s4 }
 0x321   : > { %p1157_p0 = scmp.lt.u32.totalorder %s1155_s25, %s1151_s28  ;;  %p1159_p1 = scmp.lt.u32.totalorder %s1151_s28, %s1754_s0 }
 0x322   : > { %p1153_p5 = pnand %p1152_p2, %p1837_p13 }
 0x323   : > { %p1158_p4 = por %p1157_p0, %p1156_p9 }
 0x324   : > { %p1154_p3 = pneg %p1153_p5 }
 0x325   : > { %p1160_p7 = por %p1159_p1, %p1158_p4 }
 0x327   : > { %p1161_p8 = pnand %p1160_p7, %p1154_p3 }
 0x329   : > { %1164 = shalt.err (!%p1161_p8)
}
 0x32a   : > { %s1249_s9 = smov 2048   ;;  %s1250_s18 = smov 128  }
 0x32b   : > { %971 = dma.vmem_to_hbm [thread:$0]  (%p1837_p13), %s1757_s26, 8192, %s1754_s0, %s806_s27, %s1249_s9, %s1249_s9, %s1250_s18  }
 0x32c PF: > { %p985_p10 = scmp.ge.s32.totalorder %s1239_s22, 2  ;;  %s839_s7 = sand.u32 1, %s1211_s15  }
 0x32d   : > { %p1838_p11 = scmp.ne.s32.totalorder %s1828_s6, 0  ;;  %s840_s13 = scalar_lea.sflag [#allocation5], %s839_s7 }
 0x32f   : > { %p981_p6 = pnand %p985_p10, %p1838_p11 }
 0x331   : > { %1206 = dma.done.wait (!%p981_p6), %s840_s13, 8192  }
 0x332   : > { %1208 = vsyncadd (!%p981_p6), %s840_s13, 4294959104  ;;  %s23_s22 = sadd.s32 1, %s1239_s22   ;;  %s1839_s30 = sld [smem:[#allocation12_spill]] }
 0x333   : > { %p20_p12 = scmp.ge.s32.totalorder %s23_s22, 6   ;;  %s1840_s10 = sld [smem:[#allocation13_spill]] }
 0x334   : > { %s1841_s15 = smov %s1215_s16  ;;  %s1842_s16 = smov %s1219_s17 }
 0x335   : > { %s1843_s17 = smov %s1354_s8  ;;  %s1844_s18 = smov %s1231_s20 }
 0x336   : > { %s1845_s19 = smov %s1235_s21  ;;  %22 = sbr.rel (!%p20_p12) target bundleno = 11 (0xb), region = 110 }
 0x338   : > { %s1846_s20 = smov %s1839_s30 }
 0x339   : > { %s1847_s21 = smov %s1840_s10 }
 0x33d   :  { %845 = vsyncpa [#allocation4], 1 }
 0x33e   :  { %847 = vsyncpa [#allocation4 + $0x1], 1 }
 0x33f   :  { %848 = vsyncpa [#allocation7], 1 }
 0x340   :  { %850 = vsyncpa [#allocation7 + $0x1], 1 }
 0x341   :  { %851 = vsyncpa [#allocation5], 1 }
 0x342   :  { %853 = vsyncpa [#allocation5 + $0x1], 1 }

</bundles_post_ra>
